<compile_context>
chip_gen: v5e
topology: v5e:2x2
jax: 0.10.0
libtpu: 0.0.40
codegen_flags: <defaults>
</compile_context>

<pallas_src>
import functools

import jax
import jax.numpy as jnp
from jax.experimental import pallas as pl
from jax.experimental.pallas import tpu as pltpu

_LANES = 128


def _cdiv(a, b):
    return -(-a // b)


def _round_up(a, b):
    return _cdiv(a, b) * b


def _gaussian_nll_kernel(n_valid, pred_ref, tgt_ref, lam_ref, out_ref, acc_ref):
    # pred_ref : (3, TR, 128)  -> channels (mu_x, mu_y, log_sigma)
    # tgt_ref  : (2, TR, 128)  -> channels (tgt_x, tgt_y)
    # lam_ref  : (1, 128) lane-pattern row  OR  (TR, 128) per-element weights
    # out_ref  : (1, 1) SMEM scalar output
    # acc_ref  : (1,)   SMEM running sum
    i = pl.program_id(0)

    @pl.when(i == 0)
    def _():
        acc_ref[0] = 0.0

    mu_x = pred_ref[0]
    mu_y = pred_ref[1]
    log_sigma = pred_ref[2]
    tgt_x = tgt_ref[0]
    tgt_y = tgt_ref[1]

    sq_err = (mu_x - tgt_x) ** 2 + (mu_y - tgt_y) ** 2
    # log(sigma**2) == 2*log_sigma ; 1/(2*sigma**2) == 0.5*exp(-2*log_sigma)
    loss = 2.0 * log_sigma + 0.5 * sq_err * jnp.exp(-2.0 * log_sigma)
    loss = loss * lam_ref[...]          # broadcasts (1,128) or matches (TR,128)

    # Mask out padded tail elements (global flat index >= n_valid).
    tr, lanes = mu_x.shape
    row_ids = jax.lax.broadcasted_iota(jnp.int32, (tr, lanes), 0)
    lane_ids = jax.lax.broadcasted_iota(jnp.int32, (tr, lanes), 1)
    gidx = (i * tr + row_ids) * lanes + lane_ids
    loss = jnp.where(gidx < n_valid, loss, 0.0)

    acc_ref[0] += jnp.sum(loss)

    @pl.when(i == pl.num_programs(0) - 1)
    def _():
        out_ref[0, 0] = acc_ref[0] * (1.0 / n_valid)


def gaussian_nll_loss(pred, target, lambda_weights=None, *, tile_rows=None):
    """pred: (B, K, 3), target: (B, K, 2), lambda_weights: (K,) or None."""
    B, K, C = pred.shape
    assert C == 3 and target.shape == (B, K, 2)
    pred = pred.astype(jnp.float32)
    target = target.astype(jnp.float32)

    N = B * K
    rows = _cdiv(N, _LANES)
    if tile_rows is None:
        tile_rows = min(512, _round_up(rows, 8))     # sweep 256-2048 per chip
    tile_rows = max(8, _round_up(tile_rows, 8))
    rows_pad = _round_up(rows, tile_rows)
    n_pad = rows_pad * _LANES
    num_tiles = rows_pad // tile_rows

    # Layout plumbing (no compute): stack channels and make the lane axis dense.
    pred_t = jnp.pad(pred.reshape(N, 3).T, ((0, 0), (0, n_pad - N)))
    pred_t = pred_t.reshape(3, rows_pad, _LANES)
    tgt_t = jnp.pad(target.reshape(N, 2).T, ((0, 0), (0, n_pad - N)))
    tgt_t = tgt_t.reshape(2, rows_pad, _LANES)

    in_specs = [
        pl.BlockSpec((3, tile_rows, _LANES), lambda i: (0, i, 0)),
        pl.BlockSpec((2, tile_rows, _LANES), lambda i: (0, i, 0)),
    ]
    if lambda_weights is None:
        # Tiny constant row; keeps a single kernel body.
        lam = jnp.ones((1, _LANES), jnp.float32)
        in_specs.append(pl.BlockSpec((1, _LANES), lambda i: (0, 0)))
    elif _LANES % K == 0:
        # Flat index n = b*K + k and K | 128  =>  lane l always holds
        # keypoint l % K: one (1, 128) row broadcast in-kernel, no full plane.
        lam = jnp.tile(lambda_weights.astype(jnp.float32), _LANES // K)
        lam = lam.reshape(1, _LANES)
        in_specs.append(pl.BlockSpec((1, _LANES), lambda i: (0, 0)))
    else:
        # General K: per-element weight plane, tiled like the other inputs.
        lam = jnp.pad(jnp.tile(lambda_weights.astype(jnp.float32), B),
                      (0, n_pad - N)).reshape(rows_pad, _LANES)
        in_specs.append(pl.BlockSpec((tile_rows, _LANES), lambda i: (i, 0)))

    out = pl.pallas_call(
        functools.partial(_gaussian_nll_kernel, N),
        out_shape=jax.ShapeDtypeStruct((1, 1), jnp.float32),
        grid=(num_tiles,),
        in_specs=in_specs,
        out_specs=pl.BlockSpec(memory_space=pltpu.SMEM),
        scratch_shapes=[pltpu.SMEM((1,), jnp.float32)],
        compiler_params=pltpu.CompilerParams(
            dimension_semantics=("arbitrary",)),   # sequential reduction axis
    )(pred_t, tgt_t, lam)
    return out[0, 0]


def gaussian_nll_loss_ref(pred, target, lambda_weights=None):
    """Pure-JAX reference matching the PyTorch module."""
    mu = pred[..., :2]
    sigma = jnp.exp(pred[..., 2])
    squared_error = jnp.sum((mu - target) ** 2, axis=-1)
    loss = jnp.log(sigma ** 2) + squared_error / (2.0 * sigma ** 2)
    if lambda_weights is not None:
        loss = loss * lambda_weights
    return jnp.mean(loss)


if __name__ == "__main__":
    key = jax.random.PRNGKey(0)
    k1, k2, k3, k4, k5, k6 = jax.random.split(key, 6)

    # Case 1: module-sized example (batch=2, keypoints=8); K | 128 so the
    # lambda input is a single (1, 128) lane-pattern row.
    B, K = 2, 8
    pred = jax.random.normal(k1, (B, K, 3), dtype=jnp.float32)
    target = jax.random.normal(k2, (B, K, 2), dtype=jnp.float32)
    lam_w = 0.5 + jax.random.uniform(k3, (K,), dtype=jnp.float32)
    out = jax.block_until_ready(gaussian_nll_loss(pred, target, lam_w))
    ref = gaussian_nll_loss_ref(pred, target, lam_w)
    assert jnp.allclose(out, ref, rtol=1e-5, atol=1e-5), (out, ref)

    # Case 2: K does not divide 128, multi-tile grid, masked padded tail.
    B2, K2 = 100, 17
    pred2 = jax.random.normal(k4, (B2, K2, 3), dtype=jnp.float32)
    target2 = jax.random.normal(k5, (B2, K2, 2), dtype=jnp.float32)
    lam_w2 = 0.5 + jax.random.uniform(k6, (K2,), dtype=jnp.float32)
    out2 = jax.block_until_ready(
        gaussian_nll_loss(pred2, target2, lam_w2, tile_rows=8))
    ref2 = gaussian_nll_loss_ref(pred2, target2, lam_w2)
    assert jnp.allclose(out2, ref2, rtol=1e-5, atol=1e-5), (out2, ref2)

    # Case 3: no lambda_weights buffer.
    out3 = jax.block_until_ready(
        gaussian_nll_loss(pred2, target2, None, tile_rows=8))
    ref3 = gaussian_nll_loss_ref(pred2, target2, None)
    assert jnp.allclose(out3, ref3, rtol=1e-5, atol=1e-5), (out3, ref3)

    print("KERNEL_OK")
</pallas_src>

<mosaic_0001>
module attributes {stable_mosaic.version = 11 : i64} {
  func.func @_gaussian_nll_kernel(%arg0: i32, %arg1: memref<3x8x128xf32, #tpu.memory_space<vmem>>, %arg2: memref<2x8x128xf32, #tpu.memory_space<vmem>>, %arg3: memref<1x128xf32, #tpu.memory_space<vmem>>, %arg4: memref<1x1xf32, #tpu.memory_space<smem>>, %arg5: memref<1xf32, #tpu.memory_space<smem>>) attributes {dimension_semantics = [#tpu.dimension_semantics<arbitrary>], iteration_bounds = array<i64: 1>, scalar_prefetch = 0 : i64, scratch_operands = 1 : i64, tpu.core_type = #tpu.core_type<tc>, window_params = [{transform_indices = @transform_0, window_bounds = array<i64: 3, 8, 128>}, {transform_indices = @transform_1, window_bounds = array<i64: 2, 8, 128>}, {pipeline_mode = #tpu.pipeline_mode<synchronous>, transform_indices = @transform_2, window_bounds = array<i64: 1, 128>}, {transform_indices = @transform_3, window_bounds = array<i64: 1, 1>}]} {
    %c0_i32 = arith.constant 0 : i32
    %0 = arith.cmpi eq, %arg0, %c0_i32 : i32
    %1 = arith.extui %0 : i1 to i32
    %c0_i32_0 = arith.constant 0 : i32
    %2 = arith.cmpi ne, %1, %c0_i32_0 : i32
    scf.if %2 {
      %cst_23 = arith.constant 0.000000e+00 : f32
      %c0_24 = arith.constant 0 : index
      %52 = memref.load %arg5[%c0_24] : memref<1xf32, #tpu.memory_space<smem>>
      memref.store %cst_23, %arg5[%c0_24] : memref<1xf32, #tpu.memory_space<smem>>
    } else {
    }
    %c0 = arith.constant 0 : index
    %c0_1 = arith.constant 0 : index
    %c0_2 = arith.constant 0 : index
    %3 = vector.load %arg1[%c0, %c0_1, %c0_2] : memref<3x8x128xf32, #tpu.memory_space<vmem>>, vector<1x8x128xf32>
    %4 = vector.shape_cast %3 : vector<1x8x128xf32> to vector<8x128xf32>
    %c1 = arith.constant 1 : index
    %c0_3 = arith.constant 0 : index
    %c0_4 = arith.constant 0 : index
    %5 = vector.load %arg1[%c1, %c0_3, %c0_4] : memref<3x8x128xf32, #tpu.memory_space<vmem>>, vector<1x8x128xf32>
    %6 = vector.shape_cast %5 : vector<1x8x128xf32> to vector<8x128xf32>
    %c2 = arith.constant 2 : index
    %c0_5 = arith.constant 0 : index
    %c0_6 = arith.constant 0 : index
    %7 = vector.load %arg1[%c2, %c0_5, %c0_6] : memref<3x8x128xf32, #tpu.memory_space<vmem>>, vector<1x8x128xf32>
    %8 = vector.shape_cast %7 : vector<1x8x128xf32> to vector<8x128xf32>
    %c0_7 = arith.constant 0 : index
    %c0_8 = arith.constant 0 : index
    %c0_9 = arith.constant 0 : index
    %9 = vector.load %arg2[%c0_7, %c0_8, %c0_9] : memref<2x8x128xf32, #tpu.memory_space<vmem>>, vector<1x8x128xf32>
    %10 = vector.shape_cast %9 : vector<1x8x128xf32> to vector<8x128xf32>
    %c1_10 = arith.constant 1 : index
    %c0_11 = arith.constant 0 : index
    %c0_12 = arith.constant 0 : index
    %11 = vector.load %arg2[%c1_10, %c0_11, %c0_12] : memref<2x8x128xf32, #tpu.memory_space<vmem>>, vector<1x8x128xf32>
    %12 = vector.shape_cast %11 : vector<1x8x128xf32> to vector<8x128xf32>
    %13 = arith.subf %4, %10 : vector<8x128xf32>
    %14 = arith.mulf %13, %13 : vector<8x128xf32>
    %15 = arith.subf %6, %12 : vector<8x128xf32>
    %16 = arith.mulf %15, %15 : vector<8x128xf32>
    %17 = arith.addf %14, %16 : vector<8x128xf32>
    %cst = arith.constant 2.000000e+00 : f32
    %18 = vector.broadcast %cst : f32 to vector<8x128xf32>
    %19 = arith.mulf %18, %8 : vector<8x128xf32>
    %cst_13 = arith.constant 5.000000e-01 : f32
    %20 = vector.broadcast %cst_13 : f32 to vector<8x128xf32>
    %21 = arith.mulf %20, %17 : vector<8x128xf32>
    %cst_14 = arith.constant -2.000000e+00 : f32
    %22 = vector.broadcast %cst_14 : f32 to vector<8x128xf32>
    %23 = arith.mulf %22, %8 : vector<8x128xf32>
    %24 = math.exp %23 : vector<8x128xf32>
    %25 = arith.mulf %21, %24 : vector<8x128xf32>
    %26 = arith.addf %19, %25 : vector<8x128xf32>
    %c0_15 = arith.constant 0 : index
    %c0_16 = arith.constant 0 : index
    %27 = vector.load %arg3[%c0_15, %c0_16] : memref<1x128xf32, #tpu.memory_space<vmem>>, vector<1x128xf32>
    %28 = vector.broadcast %27 : vector<1x128xf32> to vector<8x128xf32>
    %29 = arith.mulf %26, %28 : vector<8x128xf32>
    %30 = tpu.iota {dimensions = array<i32: 0>} : vector<8x128xi32>
    %31 = tpu.iota {dimensions = array<i32: 1>} : vector<8x128xi32>
    %c8_i32 = arith.constant 8 : i32
    %32 = arith.muli %arg0, %c8_i32 : i32
    %33 = vector.broadcast %32 : i32 to vector<8x128xi32>
    %34 = arith.addi %33, %30 : vector<8x128xi32>
    %c128_i32 = arith.constant 128 : i32
    %35 = vector.broadcast %c128_i32 : i32 to vector<8x128xi32>
    %36 = arith.muli %34, %35 : vector<8x128xi32>
    %37 = arith.addi %36, %31 : vector<8x128xi32>
    %c16_i32 = arith.constant 16 : i32
    %38 = vector.broadcast %c16_i32 : i32 to vector<8x128xi32>
    %39 = arith.cmpi slt, %37, %38 : vector<8x128xi32>
    %cst_17 = arith.constant 0.000000e+00 : f32
    %40 = vector.broadcast %cst_17 : f32 to vector<8x128xf32>
    %41 = arith.select %39, %29, %40 : vector<8x128xi1>, vector<8x128xf32>
    %c0_18 = arith.constant 0 : index
    %42 = memref.load %arg5[%c0_18] : memref<1xf32, #tpu.memory_space<smem>>
    %43 = vector.shape_cast %41 : vector<8x128xf32> to vector<1x8x128xf32>
    %cst_19 = arith.constant dense<0.000000e+00> : vector<1xf32>
    %44 = vector.multi_reduction <add>, %43, %cst_19 [1, 2] : vector<1x8x128xf32> to vector<1xf32>
    %45 = vector.shape_cast %44 : vector<1xf32> to vector<1x1x1xf32>
    %46 = vector.extract %45[0, 0, 0] : f32 from vector<1x1x1xf32>
    %47 = arith.addf %42, %46 : f32
    %c0_20 = arith.constant 0 : index
    %48 = memref.load %arg5[%c0_20] : memref<1xf32, #tpu.memory_space<smem>>
    memref.store %47, %arg5[%c0_20] : memref<1xf32, #tpu.memory_space<smem>>
    %c0_i32_21 = arith.constant 0 : i32
    %49 = arith.cmpi eq, %arg0, %c0_i32_21 : i32
    %50 = arith.extui %49 : i1 to i32
    %c0_i32_22 = arith.constant 0 : i32
    %51 = arith.cmpi ne, %50, %c0_i32_22 : i32
    scf.if %51 {
      %c0_23 = arith.constant 0 : index
      %52 = memref.load %arg5[%c0_23] : memref<1xf32, #tpu.memory_space<smem>>
      %cst_24 = arith.constant 6.250000e-02 : f32
      %53 = arith.mulf %52, %cst_24 : f32
      %c0_25 = arith.constant 0 : index
      %c0_26 = arith.constant 0 : index
      %54 = memref.load %arg4[%c0_25, %c0_26] : memref<1x1xf32, #tpu.memory_space<smem>>
      memref.store %53, %arg4[%c0_25, %c0_26] : memref<1x1xf32, #tpu.memory_space<smem>>
    } else {
    }
    return
  }
  func.func @transform_0(%arg0: i32) -> (i32, i32, i32) {
    %c0_i32 = arith.constant 0 : i32
    %c0_i32_0 = arith.constant 0 : i32
    %c0_i32_1 = arith.constant 0 : i32
    return %c0_i32, %arg0, %c0_i32_0 : i32, i32, i32
  }
  func.func @transform_1(%arg0: i32) -> (i32, i32, i32) {
    %c0_i32 = arith.constant 0 : i32
    %c0_i32_0 = arith.constant 0 : i32
    %c0_i32_1 = arith.constant 0 : i32
    return %c0_i32, %arg0, %c0_i32_0 : i32, i32, i32
  }
  func.func @transform_2(%arg0: i32) -> (i32, i32) {
    %c0_i32 = arith.constant 0 : i32
    %c0_i32_0 = arith.constant 0 : i32
    %c0_i32_1 = arith.constant 0 : i32
    return %c0_i32, %c0_i32_0 : i32, i32
  }
  func.func @transform_3(%arg0: i32) -> (i32, i32) {
    %c0_i32 = arith.constant 0 : i32
    %c0_i32_0 = arith.constant 0 : i32
    %c0_i32_1 = arith.constant 0 : i32
    return %c0_i32, %c0_i32_0 : i32, i32
  }
}

</mosaic_0001>

<bundles_post_ra>
// kernel: tpu_custom_call.1
= control target key start
LH: loop header
LB: loop body
LE: loop exit
PB: predicated region body
PF: predicated region fallthrough
CT: control target
= control target key end

     0   :  { %8 = vsyncpa [#allocation4], 0  ;;  %s239_s0 = inlined_call_operand.hbm [shape: f32[3,8,128], index: 0, kind: input, shape index: {}]   ;;  %s240_s1 = inlined_call_operand.hbm [shape: f32[2,8,128], index: 1, kind: input, shape index: {}]   ;;  %s241_s2 = inlined_call_operand.vmem [shape: f32[1,128], index: 2, kind: input, shape index: {}]   ;;  %s242_s3 = inlined_call_operand.hbm [shape: f32[1,1], index: 3, kind: output, shape index: {}]  }
   0x1   :  { %9 = vsyncpa [#allocation7], 0 }
   0x2   :  { %10 = vsyncpa [#allocation5], 0  ;;  %s15_s14 = sshll.u32 %s239_s0, 4  ;;  %s202_s15 = smov [#allocation3]   ;;  %s16_s14 = int_to_ptr.hbm [resolvable:$true] %s15_s14 }
   0x3   :  { %s17_s16 = sshll.u32 %s202_s15, 4  ;;  %s28_s19 = sshll.u32 %s240_s1, 4  ;;  %s18_s16 = int_to_ptr.vmem [resolvable:$true] %s17_s16  ;;  %s29_s19 = int_to_ptr.hbm [resolvable:$true] %s28_s19 }
   0x4   :  { %s203_s20 = smov 128   ;;  %s204_s21 = smov 8  }
   0x5   :  { %23 = dma.hbm_to_vmem [thread:$0]  %s16_s14, 384, %s18_s16, [#allocation4], %s203_s20, %s203_s20, %s204_s21  }
   0x6   :  { %s205_s22 = smov [#allocation6]  }
   0x7   :  { %s30_s23 = sshll.u32 %s205_s22, 4  ;;  %s31_s23 = int_to_ptr.vmem [resolvable:$true] %s30_s23 }
   0x8   :  { %36 = dma.hbm_to_vmem [thread:$0]  %s29_s19, 256, %s31_s23, [#allocation7], %s203_s20, %s203_s20, %s204_s21  }
   0x9   :  { %196 = dma.done.wait [#allocation4], 384  }
   0xa   :  { %197 = vsyncadd [#allocation4], 4294966912 }
   0xb   :  { %198 = dma.done.wait [#allocation7], 256  }
   0xc   :  { %199 = vsyncadd [#allocation7], 4294967040  ;;  %v78_v0 = vlaneseq  ;;  %v53_v1 = vld [vmem:[#allocation3] sm:$0xff]  ;;  %v55_v2 = vld [vmem:[#allocation3 + $0x8] sm:$0xff]  ;;  %s114_s26 = sshll.u32 %s242_s3, 4  ;;  %s206_s28 = smov [#allocation8]   ;;  %s115_s26 = int_to_ptr.hbm [resolvable:$true] %s114_s26 }
   0xd   :  { %v57_v3 = vld [vmem:[#allocation3 + $0x10] sm:$0xff]  ;;  %v58_v4 = vld [vmem:[#allocation6] sm:$0xff]  ;;  %v60_v5 = vld [vmem:[#allocation6 + $0x8] sm:$0xff] }
   0xe   :  { %v68_v6 = vmul.f32 -2.0, %v57_v3  ;;  %v61_v7 = vsub.f32 %v53_v1, %v58_v4  ;;  %v63_v8 = vsub.f32 %v55_v2, %v60_v5  ;;  %v79_v10 = vshrl.u32 %v78_v0, 7  ;;  %v133_v21 = vld [vmem:[%s241_s2] ss:$0 sm:$0xff] }
   0xf   :  { %v81_v14 = vand.u32 127, %v78_v0  ;;  %v66_v17 = vmul.f32 2.0, %v57_v3 }
  0x10   :  { %v69_v9 = vmul.f32 1.442695, %v68_v6  ;;  %v62_v11 = vmul.f32 %v61_v7, %v61_v7  ;;  %v64_v12 = vmul.f32 %v63_v8, %v63_v8  ;;  %v85_v15 = vmul.u32 128, %v79_v10 }
  0x12   :  { %134 = vpow2.f32 %v69_v9  ;;  %v65_v13 = vadd.f32 %v64_v12, %v62_v11  ;;  %v86_v19 = vadd.s32 %v85_v15, %v81_v14 }
  0x14   :  { %v67_v16 = vmul.f32 0.5, %v65_v13  ;;  %vm87_vm0 = vcmp.lt.s32.totalorder %v86_v19, 16 }
  0x18   :  { %v135_v18 = vpop.eup %134 }
  0x19   :  { %v71_v20 = vmul.f32 %v135_v18, %v67_v16 }
  0x1b   :  { %v72_v22 = vadd.f32 %v71_v20, %v66_v17 }
  0x1d   :  { %v77_v23 = vmul.f32 %v133_v21, %v72_v22 }
  0x1f   :  { %v88_v24 = vsel %vm87_vm0, %v77_v23, 0.0 }
  0x20   :  { %90 = vadd.xlane.f32.xlu0 %v88_v24 }
  0x93   :  { %v91_v25 = vpop.xlane.xlu0 %90 }
  0x94   :  { %v92_v26 = vrot.slane %v91_v25, 4 }
  0x96   :  { %v93_v27 = vadd.f32 %v92_v26, %v91_v25 }
  0x98   :  { %v94_v28 = vrot.slane %v93_v27, 2 }
  0x9a   :  { %v95_v29 = vadd.f32 %v94_v28, %v93_v27 }
  0x9c   :  { %v96_v30 = vrot.slane %v95_v29, 1 }
  0x9e   :  { %v97_v31 = vadd.f32 %v96_v30, %v95_v29 }
  0xa0   :  { %126 = vpush %v97_v31 }
  0xd1   :  { %s127_s27 = spop %126 }
  0xd2   :  { %s106_s2 = smul.f32 0.0625, %s127_s27 }
  0xd4   :  { %108 = sst [smem:[#allocation8]] %s106_s2 }
  0xd5   :  { %117 = dma.smem_to_hbm %s206_s28, 16, %s115_s26, [#allocation5]  }
  0xd6   :  { %200 = dma.done.wait [#allocation5], 16  }
  0xd7   :  { %201 = vsyncadd [#allocation5], 4294967280 }
  0xd8   :  { %122 = sfence }
  0xd9   :  { %123 = vsyncpa [#allocation4], 1 }
  0xda   :  { %124 = vsyncpa [#allocation7], 1 }
  0xdb   :  { %125 = vsyncpa [#allocation5], 1 }

</bundles_post_ra>
